<compile_context>
chip_gen: v7x
topology: tpu7x:2x2x1
jax: 0.10.0
libtpu: 0.0.40
codegen_flags: <defaults>
</compile_context>

<pallas_src>
import functools

import numpy as np

import jax
import jax.numpy as jnp
from jax.experimental import pallas as pl
from jax.experimental.pallas import tpu as pltpu


def _tree_lstm_kernel(adj_ref, x_ref, wih_ref, b_ref, whh_ref,
                      wfc_ref, bfc_ref, out_ref, hc_scr,
                      *, levels, mem_dim, hc_lanes, root_row):
  m = mem_dim

  # Zero-init packed (h | c) scratch: the adjacency matmul reads ALL rows,
  # so rows not yet written must be finite zeros.
  hc_scr[...] = jnp.zeros_like(hc_scr)

  # ---- Hoisted input projection: one batched MXU matmul for ALL nodes ----
  # xw[n, :] = x[n] @ W_ih_fused + (b_ih + b_hh)     -> [n_pad, 4*mem_dim]
  xw = (jnp.dot(x_ref[...], wih_ref[...], preferred_element_type=jnp.float32)
        + b_ref[...])

  c_last = None  # cell states of the last-processed (root) level

  # ---- Wavefront batching: static Python loop over tree depths ------------
  # Every (start, size) is a static multiple of 8 -> tile-aligned slices.
  for (start, size, has_children) in levels:
    xw_lvl = xw[start:start + size, :]                       # [size, 4m]

    if has_children:
      # Child-sum gather as ONE MXU matmul against the packed scratch:
      #   [size, n_pad] @ [n_pad, hc_lanes] -> [size, hc_lanes]
      child_hc = jnp.dot(adj_ref[start:start + size, :], hc_scr[...],
                         preferred_element_type=jnp.float32)
      child_h = child_hc[:, 0:m]
      child_c = child_hc[:, m:2 * m]
      # One fused recurrent matmul per level: [size, m] @ [m, 4m].
      gates = xw_lvl + jnp.dot(child_h, whh_ref[...],
                               preferred_element_type=jnp.float32)
    else:
      child_c = None
      gates = xw_lvl                                          # leaves: h_prev = 0

    # Two full-width EUP ops instead of four quarter-width ones.
    sig = jax.nn.sigmoid(gates)
    tnh = jnp.tanh(gates)
    i_g = sig[:, 0:m]
    f_g = sig[:, m:2 * m]
    g_g = tnh[:, 2 * m:3 * m]
    o_g = sig[:, 3 * m:4 * m]

    if has_children:
      c_new = f_g * child_c + i_g * g_g
    else:
      c_new = i_g * g_g                                       # child_c == 0
    h_new = o_g * jnp.tanh(c_new)

    # Lane-dense 128-lane writeback of the whole level (unmasked vst).
    hc = jnp.concatenate([h_new, c_new], axis=1)              # [size, 2m]
    pad = hc_lanes - 2 * m
    if pad == 2 * m:
      row = jnp.concatenate([hc, hc], axis=1)                 # [h|c|h|c]
    elif pad > 0:
      row = jnp.concatenate(
          [hc, jnp.zeros((size, pad), jnp.float32)], axis=1)
    else:
      row = hc
    hc_scr[pl.ds(start, size), :] = row

    c_last = c_new

  # ---- FC applied to the root *cell* state (matches FC(state[1])) ---------
  c_root = c_last[root_row:root_row + 1, :]                   # [1, mem_dim]
  out_ref[...] = (jnp.dot(c_root, wfc_ref[...],
                          preferred_element_type=jnp.float32)
                  + bfc_ref[...])


def _build_schedule(children_np):
  """Host-side schedule: depth-ordered, 8-padded levels + adjacency matrix.

  children_np: [n, max_child] int32, -1 padded; children must have smaller
  index than their parent (topological order); node n-1 is the root.
  Returns (levels, adjacency, order, root_row, n_pad) where
    levels     : tuple of (start, padded_size, has_children) per depth,
                 start/size multiples of 8,
    adjacency  : [n_pad, n_pad] f32, adjacency[p, c] = 1.0 iff c is a child
                 of p (in the padded/permuted layout),
    order      : [n_pad] original node index per padded slot (-1 = dummy),
    root_row   : row of the root within the last level.
  """
  n, max_child = children_np.shape
  depth = np.zeros((n,), dtype=np.int64)
  for node in range(n):
    d = 0
    for j in range(max_child):
      c = int(children_np[node, j])
      if c >= 0:
        if c >= node:
          raise ValueError("children must precede their parent in the layout")
        d = max(d, int(depth[c]) + 1)
    depth[node] = d
  max_d = int(depth.max())
  if int(depth[n - 1]) != max_d:
    raise ValueError("node n-1 (the root) must have the maximum depth")

  order = []                      # original node index per padded slot
  levels = []
  for d in range(max_d + 1):
    idx = np.nonzero(depth == d)[0]
    start = len(order)
    order.extend(int(i) for i in idx)
    size = int(idx.size)
    padded = -(-size // 8) * 8    # pad level size to a sublane-tile multiple
    order.extend([-1] * (padded - size))
    has_children = bool(np.any(children_np[idx] >= 0))
    levels.append((start, padded, has_children))
  n_pad = len(order)
  order = np.asarray(order, dtype=np.int64)

  new_of_old = np.full((n,), -1, dtype=np.int64)
  for new, old in enumerate(order):
    if old >= 0:
      new_of_old[old] = new

  adj = np.zeros((n_pad, n_pad), dtype=np.float32)
  for old in range(n):
    for j in range(max_child):
      c = int(children_np[old, j])
      if c >= 0:
        adj[new_of_old[old], new_of_old[c]] = 1.0

  root_row = int(new_of_old[n - 1]) - levels[-1][0]
  return tuple(levels), adj, order, root_row, n_pad


def tree_lstm_forward(children, x, wih_fused, b_comb, whh_fused, wfc_t, bfc):
  """children: [n_nodes, max_child] int32 (-1 pad), topological, root last.
  x: [n_nodes, in_dim]. wih_fused: [in_dim, 4m]. b_comb: [1, 4m].
  whh_fused: [m, 4m]. wfc_t: [m, num_classes]. bfc: [1, num_classes]."""
  children_np = np.asarray(jax.device_get(children), dtype=np.int32)
  mem_dim = whh_fused.shape[0]
  num_classes = wfc_t.shape[1]

  levels, adj_np, order, root_row, n_pad = _build_schedule(children_np)

  # Permute node features into the depth-ordered, 8-padded layout
  # (dummy rows get x = 0).  This is cheap XLA pre-processing, not kernel.
  safe = jnp.asarray(np.maximum(order, 0))
  mask = jnp.asarray((order >= 0).astype(np.float32)[:, None])
  x_pad = x[safe] * mask

  # Packed (h | c) row width, rounded up to a full 128-lane vreg row.
  hc_lanes = max(128, -(-2 * mem_dim // 128) * 128)

  kernel = functools.partial(_tree_lstm_kernel, levels=levels,
                             mem_dim=mem_dim, hc_lanes=hc_lanes,
                             root_row=root_row)
  return pl.pallas_call(
      kernel,
      out_shape=jax.ShapeDtypeStruct((1, num_classes), jnp.float32),
      in_specs=[
          pl.BlockSpec(memory_space=pltpu.MemorySpace.VMEM),   # adjacency
          pl.BlockSpec(memory_space=pltpu.MemorySpace.VMEM),   # x (padded)
          pl.BlockSpec(memory_space=pltpu.MemorySpace.VMEM),   # W_ih fused
          pl.BlockSpec(memory_space=pltpu.MemorySpace.VMEM),   # combined bias
          pl.BlockSpec(memory_space=pltpu.MemorySpace.VMEM),   # W_hh fused
          pl.BlockSpec(memory_space=pltpu.MemorySpace.VMEM),   # FC weight^T
          pl.BlockSpec(memory_space=pltpu.MemorySpace.VMEM),   # FC bias
      ],
      out_specs=pl.BlockSpec(memory_space=pltpu.MemorySpace.VMEM),
      scratch_shapes=[
          pltpu.VMEM((n_pad, hc_lanes), jnp.float32),          # packed (h|c)
      ],
      compiler_params=pltpu.CompilerParams(
          # Everything here is tiny; re-derive against 64 MiB (v7x) if
          # n_pad / a per-step tree batch grows.
          vmem_limit_bytes=32 * 1024 * 1024,
      ),
  )(jnp.asarray(adj_np), x_pad, wih_fused, b_comb, whh_fused, wfc_t, bfc)


def _reference(x, children, w_ih, w_hh, b_ih, b_hh, w_fc, b_fc, mem_dim):
  """Pure-JAX re-implementation of naiveTreeLSTM.forward for verification."""
  n = x.shape[0]
  h = jnp.zeros((n, mem_dim), jnp.float32)
  c = jnp.zeros((n, mem_dim), jnp.float32)
  children = np.asarray(jax.device_get(children))
  for node in range(n):
    ch = jnp.zeros((mem_dim,), jnp.float32)
    cc = jnp.zeros((mem_dim,), jnp.float32)
    for j in range(children.shape[1]):
      idx = int(children[node, j])
      if idx >= 0:
        ch = ch + h[idx]
        cc = cc + c[idx]
    gates = x[node] @ w_ih.T + b_ih + ch @ w_hh.T + b_hh
    i_g = jax.nn.sigmoid(gates[0:mem_dim])
    f_g = jax.nn.sigmoid(gates[mem_dim:2 * mem_dim])
    g_g = jnp.tanh(gates[2 * mem_dim:3 * mem_dim])
    o_g = jax.nn.sigmoid(gates[3 * mem_dim:4 * mem_dim])
    cn = f_g * cc + i_g * g_g
    hn = o_g * jnp.tanh(cn)
    h = h.at[node].set(hn)
    c = c.at[node].set(cn)
  return (c[n - 1] @ w_fc.T + b_fc)[None, :]


if __name__ == "__main__":
  in_dim, mem_dim, num_classes = 16, 32, 8   # 4*mem_dim = 128 (lane-dense)

  # 10-node tree in topological order (leaves first, root last), with uneven
  # fan-out to exercise the child-sum adjacency:
  #   leaves: 0..5
  #   level 1: 6=(0,1,2)   7=(3,4)   8=(5)
  #   root   : 9=(6,7,8)
  MAX_CHILD = 3
  children = jnp.array(
      [[-1, -1, -1], [-1, -1, -1], [-1, -1, -1],
       [-1, -1, -1], [-1, -1, -1], [-1, -1, -1],
       [0, 1, 2], [3, 4, -1], [5, -1, -1],
       [6, 7, 8]],
      dtype=jnp.int32)
  n_nodes = children.shape[0]

  key = jax.random.PRNGKey(0)
  k_x, k1, k2, k3, k4, k5, k6 = jax.random.split(key, 7)
  x = jax.random.normal(k_x, (n_nodes, in_dim), jnp.float32)

  # PyTorch-style uniform(-1/sqrt(m), 1/sqrt(m)) init.
  bound = 1.0 / (mem_dim ** 0.5)
  w_ih = jax.random.uniform(k1, (4 * mem_dim, in_dim), jnp.float32, -bound, bound)
  w_hh = jax.random.uniform(k2, (4 * mem_dim, mem_dim), jnp.float32, -bound, bound)
  b_ih = jax.random.uniform(k3, (4 * mem_dim,), jnp.float32, -bound, bound)
  b_hh = jax.random.uniform(k4, (4 * mem_dim,), jnp.float32, -bound, bound)
  w_fc = jax.random.uniform(k5, (num_classes, mem_dim), jnp.float32, -bound, bound)
  b_fc = jax.random.uniform(k6, (num_classes,), jnp.float32, -bound, bound)

  # Repack for the kernel: fused, pre-transposed weights (gate order i,f,g,o
  # is preserved along the 4*mem_dim output axis).
  wih_fused = w_ih.T                                   # [in_dim, 4*mem_dim]
  whh_fused = w_hh.T                                   # [mem_dim, 4*mem_dim]
  b_comb = (b_ih + b_hh).reshape(1, 4 * mem_dim)       # [1, 4*mem_dim]
  wfc_t = w_fc.T                                       # [mem_dim, num_classes]
  bfc = b_fc.reshape(1, num_classes)

  out = tree_lstm_forward(children, x, wih_fused, b_comb, whh_fused, wfc_t, bfc)
  out = jax.block_until_ready(out)

  ref = _reference(x, children, w_ih, w_hh, b_ih, b_hh, w_fc, b_fc, mem_dim)
  assert out.shape == (1, num_classes)
  assert jnp.allclose(out, ref, rtol=1e-4, atol=1e-4), (out, ref)

  print("KERNEL_OK")
</pallas_src>

<mosaic_0001>
module attributes {stable_mosaic.version = 11 : i64} {
  func.func @_tree_lstm_kernel(%arg0: memref<24x24xf32, #tpu.memory_space<vmem>>, %arg1: memref<24x16xf32, #tpu.memory_space<vmem>>, %arg2: memref<16x128xf32, #tpu.memory_space<vmem>>, %arg3: memref<1x128xf32, #tpu.memory_space<vmem>>, %arg4: memref<32x128xf32, #tpu.memory_space<vmem>>, %arg5: memref<32x8xf32, #tpu.memory_space<vmem>>, %arg6: memref<1x8xf32, #tpu.memory_space<vmem>>, %arg7: memref<1x8xf32, #tpu.memory_space<vmem>>, %arg8: memref<24x128xf32, #tpu.memory_space<vmem>>) attributes {dimension_semantics = [], scalar_prefetch = 0 : i64, scratch_operands = 1 : i64, tpu.core_type = #tpu.core_type<tc>} {
    %cst = arith.constant 0.000000e+00 : f32
    %0 = vector.broadcast %cst : f32 to vector<24x128xf32>
    %c0 = arith.constant 0 : index
    %c0_0 = arith.constant 0 : index
    %1 = vector.load %arg8[%c0, %c0_0] : memref<24x128xf32, #tpu.memory_space<vmem>>, vector<24x128xf32>
    tpu.vector_store %arg8[%c0, %c0_0], %0 {strides = array<i32>} : memref<24x128xf32, #tpu.memory_space<vmem>>, vector<24x128xf32>,
    %c0_1 = arith.constant 0 : index
    %c0_2 = arith.constant 0 : index
    %2 = vector.load %arg1[%c0_1, %c0_2] : memref<24x16xf32, #tpu.memory_space<vmem>>, vector<24x16xf32>
    %c0_3 = arith.constant 0 : index
    %c0_4 = arith.constant 0 : index
    %3 = vector.load %arg2[%c0_3, %c0_4] : memref<16x128xf32, #tpu.memory_space<vmem>>, vector<16x128xf32>
    %cst_5 = arith.constant dense<0.000000e+00> : vector<24x128xf32>
    %4 = tpu.matmul %2, %3, %cst_5 {dimension_numbers = #tpu.dot_dimension_numbers<[1], [0], [0], [1], [0, 0, 1, 1], [], []>} : vector<24x16xf32>, vector<16x128xf32>, vector<24x128xf32> -> vector<24x128xf32>
    %c0_6 = arith.constant 0 : index
    %c0_7 = arith.constant 0 : index
    %5 = vector.load %arg3[%c0_6, %c0_7] : memref<1x128xf32, #tpu.memory_space<vmem>>, vector<1x128xf32>
    %6 = vector.broadcast %5 : vector<1x128xf32> to vector<24x128xf32>
    %7 = arith.addf %4, %6 : vector<24x128xf32>
    %8 = vector.extract_strided_slice %7 {offsets = [0, 0], sizes = [8, 128], strides = [1, 1]} : vector<24x128xf32> to vector<8x128xf32>
    %9 = arith.negf %8 : vector<8x128xf32>
    %10 = math.exp %9 : vector<8x128xf32>
    %cst_8 = arith.constant 1.000000e+00 : f32
    %11 = vector.broadcast %cst_8 : f32 to vector<8x128xf32>
    %12 = arith.addf %11, %10 : vector<8x128xf32>
    %13 = arith.divf %11, %12 : vector<8x128xf32>
    %14 = math.tanh %8 : vector<8x128xf32>
    %15 = vector.extract_strided_slice %13 {offsets = [0, 0], sizes = [8, 32], strides = [1, 1]} : vector<8x128xf32> to vector<8x32xf32>
    %16 = vector.extract_strided_slice %14 {offsets = [0, 64], sizes = [8, 32], strides = [1, 1]} : vector<8x128xf32> to vector<8x32xf32>
    %17 = vector.extract_strided_slice %13 {offsets = [0, 96], sizes = [8, 32], strides = [1, 1]} : vector<8x128xf32> to vector<8x32xf32>
    %18 = arith.mulf %15, %16 : vector<8x32xf32>
    %19 = math.tanh %18 : vector<8x32xf32>
    %20 = arith.mulf %17, %19 : vector<8x32xf32>
    %21 = tpu.concatenate %20, %18 in 1 : vector<8x32xf32>, vector<8x32xf32> -> vector<8x64xf32>
    %22 = tpu.concatenate %21, %21 in 1 : vector<8x64xf32>, vector<8x64xf32> -> vector<8x128xf32>
    %c0_9 = arith.constant 0 : index
    %c0_10 = arith.constant 0 : index
    %23 = vector.load %arg8[%c0_9, %c0_10] : memref<24x128xf32, #tpu.memory_space<vmem>>, vector<8x128xf32>
    tpu.vector_store %arg8[%c0_9, %c0_10], %22 {strides = array<i32>} : memref<24x128xf32, #tpu.memory_space<vmem>>, vector<8x128xf32>,
    %24 = vector.extract_strided_slice %7 {offsets = [8, 0], sizes = [8, 128], strides = [1, 1]} : vector<24x128xf32> to vector<8x128xf32>
    %c8 = arith.constant 8 : index
    %c0_11 = arith.constant 0 : index
    %25 = vector.load %arg0[%c8, %c0_11] : memref<24x24xf32, #tpu.memory_space<vmem>>, vector<8x24xf32>
    %c0_12 = arith.constant 0 : index
    %c0_13 = arith.constant 0 : index
    %26 = vector.load %arg8[%c0_12, %c0_13] : memref<24x128xf32, #tpu.memory_space<vmem>>, vector<24x128xf32>
    %cst_14 = arith.constant dense<0.000000e+00> : vector<8x128xf32>
    %27 = tpu.matmul %25, %26, %cst_14 {dimension_numbers = #tpu.dot_dimension_numbers<[1], [0], [0], [1], [0, 0, 1, 1], [], []>} : vector<8x24xf32>, vector<24x128xf32>, vector<8x128xf32> -> vector<8x128xf32>
    %28 = vector.extract_strided_slice %27 {offsets = [0, 0], sizes = [8, 32], strides = [1, 1]} : vector<8x128xf32> to vector<8x32xf32>
    %29 = vector.extract_strided_slice %27 {offsets = [0, 32], sizes = [8, 32], strides = [1, 1]} : vector<8x128xf32> to vector<8x32xf32>
    %c0_15 = arith.constant 0 : index
    %c0_16 = arith.constant 0 : index
    %30 = vector.load %arg4[%c0_15, %c0_16] : memref<32x128xf32, #tpu.memory_space<vmem>>, vector<32x128xf32>
    %cst_17 = arith.constant dense<0.000000e+00> : vector<8x128xf32>
    %31 = tpu.matmul %28, %30, %cst_17 {dimension_numbers = #tpu.dot_dimension_numbers<[1], [0], [0], [1], [0, 0, 1, 1], [], []>} : vector<8x32xf32>, vector<32x128xf32>, vector<8x128xf32> -> vector<8x128xf32>
    %32 = arith.addf %24, %31 : vector<8x128xf32>
    %33 = arith.negf %32 : vector<8x128xf32>
    %34 = math.exp %33 : vector<8x128xf32>
    %cst_18 = arith.constant 1.000000e+00 : f32
    %35 = vector.broadcast %cst_18 : f32 to vector<8x128xf32>
    %36 = arith.addf %35, %34 : vector<8x128xf32>
    %37 = arith.divf %35, %36 : vector<8x128xf32>
    %38 = math.tanh %32 : vector<8x128xf32>
    %39 = vector.extract_strided_slice %37 {offsets = [0, 0], sizes = [8, 32], strides = [1, 1]} : vector<8x128xf32> to vector<8x32xf32>
    %40 = vector.extract_strided_slice %37 {offsets = [0, 32], sizes = [8, 32], strides = [1, 1]} : vector<8x128xf32> to vector<8x32xf32>
    %41 = vector.extract_strided_slice %38 {offsets = [0, 64], sizes = [8, 32], strides = [1, 1]} : vector<8x128xf32> to vector<8x32xf32>
    %42 = vector.extract_strided_slice %37 {offsets = [0, 96], sizes = [8, 32], strides = [1, 1]} : vector<8x128xf32> to vector<8x32xf32>
    %43 = arith.mulf %40, %29 : vector<8x32xf32>
    %44 = arith.mulf %39, %41 : vector<8x32xf32>
    %45 = arith.addf %43, %44 : vector<8x32xf32>
    %46 = math.tanh %45 : vector<8x32xf32>
    %47 = arith.mulf %42, %46 : vector<8x32xf32>
    %48 = tpu.concatenate %47, %45 in 1 : vector<8x32xf32>, vector<8x32xf32> -> vector<8x64xf32>
    %49 = tpu.concatenate %48, %48 in 1 : vector<8x64xf32>, vector<8x64xf32> -> vector<8x128xf32>
    %c8_19 = arith.constant 8 : index
    %c0_20 = arith.constant 0 : index
    %50 = vector.load %arg8[%c8_19, %c0_20] : memref<24x128xf32, #tpu.memory_space<vmem>>, vector<8x128xf32>
    tpu.vector_store %arg8[%c8_19, %c0_20], %49 {strides = array<i32>} : memref<24x128xf32, #tpu.memory_space<vmem>>, vector<8x128xf32>,
    %51 = vector.extract_strided_slice %7 {offsets = [16, 0], sizes = [8, 128], strides = [1, 1]} : vector<24x128xf32> to vector<8x128xf32>
    %c16 = arith.constant 16 : index
    %c0_21 = arith.constant 0 : index
    %52 = vector.load %arg0[%c16, %c0_21] : memref<24x24xf32, #tpu.memory_space<vmem>>, vector<8x24xf32>
    %c0_22 = arith.constant 0 : index
    %c0_23 = arith.constant 0 : index
    %53 = vector.load %arg8[%c0_22, %c0_23] : memref<24x128xf32, #tpu.memory_space<vmem>>, vector<24x128xf32>
    %cst_24 = arith.constant dense<0.000000e+00> : vector<8x128xf32>
    %54 = tpu.matmul %52, %53, %cst_24 {dimension_numbers = #tpu.dot_dimension_numbers<[1], [0], [0], [1], [0, 0, 1, 1], [], []>} : vector<8x24xf32>, vector<24x128xf32>, vector<8x128xf32> -> vector<8x128xf32>
    %55 = vector.extract_strided_slice %54 {offsets = [0, 0], sizes = [8, 32], strides = [1, 1]} : vector<8x128xf32> to vector<8x32xf32>
    %56 = vector.extract_strided_slice %54 {offsets = [0, 32], sizes = [8, 32], strides = [1, 1]} : vector<8x128xf32> to vector<8x32xf32>
    %c0_25 = arith.constant 0 : index
    %c0_26 = arith.constant 0 : index
    %57 = vector.load %arg4[%c0_25, %c0_26] : memref<32x128xf32, #tpu.memory_space<vmem>>, vector<32x128xf32>
    %cst_27 = arith.constant dense<0.000000e+00> : vector<8x128xf32>
    %58 = tpu.matmul %55, %57, %cst_27 {dimension_numbers = #tpu.dot_dimension_numbers<[1], [0], [0], [1], [0, 0, 1, 1], [], []>} : vector<8x32xf32>, vector<32x128xf32>, vector<8x128xf32> -> vector<8x128xf32>
    %59 = arith.addf %51, %58 : vector<8x128xf32>
    %60 = arith.negf %59 : vector<8x128xf32>
    %61 = math.exp %60 : vector<8x128xf32>
    %cst_28 = arith.constant 1.000000e+00 : f32
    %62 = vector.broadcast %cst_28 : f32 to vector<8x128xf32>
    %63 = arith.addf %62, %61 : vector<8x128xf32>
    %64 = arith.divf %62, %63 : vector<8x128xf32>
    %65 = math.tanh %59 : vector<8x128xf32>
    %66 = vector.extract_strided_slice %64 {offsets = [0, 0], sizes = [8, 32], strides = [1, 1]} : vector<8x128xf32> to vector<8x32xf32>
    %67 = vector.extract_strided_slice %64 {offsets = [0, 32], sizes = [8, 32], strides = [1, 1]} : vector<8x128xf32> to vector<8x32xf32>
    %68 = vector.extract_strided_slice %65 {offsets = [0, 64], sizes = [8, 32], strides = [1, 1]} : vector<8x128xf32> to vector<8x32xf32>
    %69 = vector.extract_strided_slice %64 {offsets = [0, 96], sizes = [8, 32], strides = [1, 1]} : vector<8x128xf32> to vector<8x32xf32>
    %70 = arith.mulf %67, %56 : vector<8x32xf32>
    %71 = arith.mulf %66, %68 : vector<8x32xf32>
    %72 = arith.addf %70, %71 : vector<8x32xf32>
    %73 = math.tanh %72 : vector<8x32xf32>
    %74 = arith.mulf %69, %73 : vector<8x32xf32>
    %75 = tpu.concatenate %74, %72 in 1 : vector<8x32xf32>, vector<8x32xf32> -> vector<8x64xf32>
    %76 = tpu.concatenate %75, %75 in 1 : vector<8x64xf32>, vector<8x64xf32> -> vector<8x128xf32>
    %c16_29 = arith.constant 16 : index
    %c0_30 = arith.constant 0 : index
    %77 = vector.load %arg8[%c16_29, %c0_30] : memref<24x128xf32, #tpu.memory_space<vmem>>, vector<8x128xf32>
    tpu.vector_store %arg8[%c16_29, %c0_30], %76 {strides = array<i32>} : memref<24x128xf32, #tpu.memory_space<vmem>>, vector<8x128xf32>,
    %78 = vector.extract_strided_slice %72 {offsets = [0, 0], sizes = [1, 32], strides = [1, 1]} : vector<8x32xf32> to vector<1x32xf32>
    %c0_31 = arith.constant 0 : index
    %c0_32 = arith.constant 0 : index
    %79 = vector.load %arg5[%c0_31, %c0_32] : memref<32x8xf32, #tpu.memory_space<vmem>>, vector<32x8xf32>
    %cst_33 = arith.constant dense<0.000000e+00> : vector<1x8xf32>
    %80 = tpu.matmul %78, %79, %cst_33 {dimension_numbers = #tpu.dot_dimension_numbers<[1], [0], [0], [1], [0, 0, 1, 1], [], []>} : vector<1x32xf32>, vector<32x8xf32>, vector<1x8xf32> -> vector<1x8xf32>
    %c0_34 = arith.constant 0 : index
    %c0_35 = arith.constant 0 : index
    %81 = vector.load %arg6[%c0_34, %c0_35] : memref<1x8xf32, #tpu.memory_space<vmem>>, vector<1x8xf32>
    %82 = arith.addf %80, %81 : vector<1x8xf32>
    %c0_36 = arith.constant 0 : index
    %c0_37 = arith.constant 0 : index
    %83 = vector.load %arg7[%c0_36, %c0_37] : memref<1x8xf32, #tpu.memory_space<vmem>>, vector<1x8xf32>
    tpu.vector_store %arg7[%c0_36, %c0_37], %82 {strides = array<i32>} : memref<1x8xf32, #tpu.memory_space<vmem>>, vector<1x8xf32>,
    return
  }
}

</mosaic_0001>

<bundles_post_ra>
// kernel: tpu_custom_call.1
= control target key start
LH: loop header
LB: loop body
LE: loop exit
PB: predicated region body
PF: predicated region fallthrough
CT: control target
= control target key end

     0   :  { %v823_v2 = vmov 0.0|0.0   ;;  %vm824_vm0 = vmmov 0   ;;  %v825_v4 = vmov 0.0   ;;  %s989_s0 = inlined_call_operand.vmem [shape: f32[24,24], index: 0, kind: input, shape index: {}]   ;;  %s990_s1 = inlined_call_operand.vmem [shape: f32[24,16], index: 1, kind: input, shape index: {}]   ;;  %s991_s2 = inlined_call_operand.vmem [shape: f32[16,128], index: 2, kind: input, shape index: {}]   ;;  %s992_s3 = inlined_call_operand.vmem [shape: f32[1,128], index: 3, kind: input, shape index: {}]   ;;  %s993_s4 = inlined_call_operand.vmem [shape: f32[32,128], index: 4, kind: input, shape index: {}]   ;;  %s994_s5 = inlined_call_operand.vmem [shape: f32[32,8], index: 5, kind: input, shape index: {}]   ;;  %s995_s6 = inlined_call_operand.vmem [shape: f32[1,8], index: 6, kind: input, shape index: {}]   ;;  %s996_s7 = inlined_call_operand.hbm [shape: f32[1,8], index: 7, kind: output, shape index: {}]  }
   0x1   :  { %v33_v0 = vld [vmem:[%s991_s2] sm:$0xff]  ;;  %v34_v1 = vld [vmem:[%s991_s2 + $0x8] sm:$0xff]  ;;  %739 = vmatprep.subr.bf16.mxu0 %v823_v2  ;;  %685 = vmatprep.mubr.msk.f32.mxu0 %vm824_vm0, %v825_v4 }
   0x2   :  { %v740_v3 = vpack.c.bf16 %v34_v1, %v33_v0 }
   0x3   :  { %12 = vsyncpa [#allocation4], 0  ;;  %763 = vmatprep.subr.bf16.mxu1 %v823_v2  ;;  %691 = vmatprep.mubr.msk.f32.mxu1 %vm824_vm0, %v825_v4  ;;  %v30_v5 = vld [vmem:[%s990_s1] sm:$0xff]  ;;  %vm42_vm1 = vcmask 130048   ;;  %s826_s8 = smov 64   ;;  %v32_v18 = vld [vmem:[%s990_s1 + $0x10] sm:$0xff] }
   0x4   :  { %741 = vmatpush3.bf16.msra.mxu0 %v740_v3  ;;  %764 = vmatpush3.bf16.msra.mxu1 %v740_v3  ;;  %v893_v6 = vld [vmem:[%s992_s3] ss:$0 sm:$0xff]  ;;  %s827_s3 = smov 96   ;;  %s828_s11 = smov 32   ;;  %v246_v22 = vld [vmem:[%s993_s4 + $0x8] sm:$0xff]  ;;  %v247_v25 = vld [vmem:[%s993_s4 + $0x10] sm:$0xff] }
   0x5   :  { %694 = vmatprep.subr.mxu1 %v825_v4  ;;  %742 = vmatprep.subr.bf16.mxu0 %v823_v2  ;;  %v245_v21 = vld [vmem:[%s993_s4] sm:$0xff]  ;;  %v31_v23 = vld [vmem:[%s990_s1 + $0x8] sm:$0xff]  ;;  %v248_v26 = vld [vmem:[%s993_s4 + $0x18] sm:$0xff]  ;;  %vm158_vm2 = vcmask 261120   ;;  %vm164_vm3 = vcmask 523264   ;;  %vm171_vm4 = vcmask 195584  }
   0x6   :  { %v743_v24 = vpack.c.bf16 %v246_v22, %v245_v21  ;;  %v746_v27 = vpack.c.bf16 %v248_v26, %v247_v25  ;;  %v167_v34 = vld [vmem:[%s989_s0 + $0x8] sm:$0xff]  ;;  %v358_v59 = vld [vmem:[%s989_s0 + $0x10] sm:$0xff]  ;;  %vm628_vm5 = vcmask 57344  }
   0x7   :  { %686 = vmatmul.mubr.msk.f32.vlgmr.msra.gmra.mrb[0].mxu0 %vm42_vm1, %v30_v5  ;;  %692 = vmatmul.mubr.msk.f32.vlgmr.msra.gmra.mrb[0].mxu1 %vm42_vm1, %v32_v18 }
   0x8   :  { %688 = vmatprep.mubr.msk.f32.mxu0 %vm824_vm0, %v825_v4  ;;  %696 = vmatprep.mubr.msk.f32.mxu1 %vm824_vm0, %v825_v4 }
   0x9   :  { %744 = vmatpush3.bf16.msra.mxu0 %v743_v24 }
   0xa   :  { %745 = vmatprep.subr.bf16.mxu0 %v823_v2 }
   0xb   :  { %689 = vmatmul.mubr.msk.f32.gmra.mrb[2].mxu0 %vm42_vm1, %v31_v23 }
   0xc   :  { %707 = vmatprep.mubr.msk.f32.mxu0 %vm824_vm0, %v825_v4 }
   0xd   :  { %747 = vmatpush3.bf16.msra.mxu0 %v746_v27 }
   0xe   :  { %751 = vmatprep.subr.bf16.mxu0 %v823_v2 }
  0xda   :  { %v118_v7 = vpop.f32.mrb[0].mxu0  ;;  %v128_v31 = vpop.f32.mrb[0].mxu1 }
  0xdb   :  { %v119_v8 = vadd.f32 %v893_v6, %v118_v7  ;;  %v687_v9 = vpop.f32.mrb[1].mxu0  ;;  %v693_v32 = vpop.f32.mrb[1].mxu1  ;;  %v129_v62 = vadd.f32 %v893_v6, %v128_v31 }
  0xdc   :  { %v550_v9 = vld [vmem:[%s994_s5 + $0x10] sm:$0xff] }
  0xdd   :  { %777 = vtanh.f32 %v119_v8  ;;  %v648_v11 = vmul.f32 -1.442695, %v119_v8 }
  0xdf   :  { %779 = vpow2.f32 %v648_v11  ;;  %v551_v11 = vld [vmem:[%s994_s5 + $0x18] sm:$0xff] }
  0xe7   :  { %v778_v10 = vpop.eup %777 }
  0xe8   :  { %140 = vrot.lane.b32.xlu0 %v778_v10, %s826_s8 }
  0xe9   :  { %v780_v12 = vpop.eup %779 }
  0xea   :  { %v135_v13 = vadd.f32 1.0, %v780_v12  ;;  %v761_v12 = vpack.c.bf16 %v551_v11, %v550_v9 }
  0xec   :  { %781 = vrcp.f32 %v135_v13 }
  0xf6   :  { %v782_v14 = vpop.eup %781 }
 0x15a   :  { %v141_v15 = vpop.permute.xlu0 %140 }
 0x15b   :  { %v143_v16 = vmul.f32 %v782_v14, %v141_v15 }
 0x15d   :  { %783 = vtanh.f32 %v143_v16 }
 0x167   :  { %v784_v17 = vpop.eup %783 }
 0x168   :  { %146 = vrot.lane.b32.xlu0 %v784_v17, %s827_s3 }
 0x1da   :  { %v147_v19 = vpop.permute.xlu0 %146 }
 0x1db   :  { %v149_v20 = vmul.f32 %v782_v14, %v147_v19 }
 0x1dd   :  { %151 = vrot.lane.b32.xlu1 %v149_v20, %s828_s11  ;;  %v552_v20 = vld [vmem:[%s995_s6] sm:$0x1] }
 0x1e1   :  { %155 = vrot.lane.b32.xlu1 %v143_v16, %s828_s11 }
 0x24f   :  { %v152_v28 = vpop.permute.xlu1 %151 }
 0x253   :  { %v156_v29 = vpop.permute.xlu1 %155 }
 0x254   :  { %v159_v30 = vsel %vm158_vm2, %v152_v28, %v156_v29 }
 0x255   :  { %161 = vrot.lane.b32.xlu0 %v159_v30, %s826_s8 }
 0x2c7   :  { %v162_v33 = vpop.permute.xlu0 %161 }
 0x2c8   :  { %v165_v35 = vsel %vm164_vm3, %v159_v30, %v162_v33 }
 0x2c9   :  { %695 = vmatpush3.msra.mxu1 %v165_v35 }
 0x2ca   :  { %697 = vmatmul.mubr.msk.f32.vlgmr.msra.gmra.mrb[2].mxu1 %vm171_vm4, %v167_v34  ;;  %748 = vmatprep.subr.bf16.mxu1 %v823_v2 }
 0x2cb   :  { %714 = vmatprep.mubr.msk.f32.mxu1 %vm824_vm0, %v825_v4 }
 0x39d   :  { %v241_v36 = vpop.f32.mrb[2].mxu1 }
 0x39e   :  { %708 = vmatmul.mubr.msk.f32.vlgmr.msra.gmra.mrb[2].mxu0 %vm158_vm2, %v241_v36  ;;  %v698_v37 = vpop.f32.mrb[3].mxu1 }
 0x39f   :  { %753 = vmatpush3.bf16.msra.mxu0 %v743_v24  ;;  %725 = vmatprep.mubr.msk.f32.mxu0 %vm824_vm0, %v825_v4 }
 0x3a0   :  { %754 = vmatprep.subr.bf16.mxu0 %v823_v2 }
 0x3a3   :  { %756 = vmatpush3.bf16.msra.mxu0 %v746_v27 }
 0x471   :  { %v318_v38 = vpop.f32.mrb[2].mxu0 }
 0x472   :  { %v765_v39 = vadd.f32 %v893_v6, %v318_v38  ;;  %v709_v40 = vpop.f32.mrb[3].mxu0  ;;  %v549_v6 = vld [vmem:[%s994_s5 + $0x8] sm:$0xff] }
 0x474   :  { %785 = vtanh.f32 %v765_v39  ;;  %v651_v42 = vmul.f32 -1.442695, %v765_v39 }
 0x476   :  { %787 = vpow2.f32 %v651_v42 }
 0x47e   :  { %v786_v41 = vpop.eup %785 }
 0x47f   :  { %332 = vrot.lane.b32.xlu1 %v786_v41, %s826_s8 }
 0x480   :  { %v788_v43 = vpop.eup %787 }
 0x481   :  { %v326_v44 = vadd.f32 1.0, %v788_v43 }
 0x483   :  { %789 = vrcp.f32 %v326_v44 }
 0x48d   :  { %v790_v45 = vpop.eup %789 }
 0x48e   :  { %v330_v48 = vmul.f32 %v790_v45, %v241_v36 }
 0x4f1   :  { %v333_v46 = vpop.permute.xlu1 %332 }
 0x4f2   :  { %v335_v47 = vmul.f32 %v790_v45, %v333_v46 }
 0x4f4   :  { %337 = vrot.lane.b32.xlu0 %v335_v47, %s828_s11 }
 0x566   :  { %v338_v49 = vpop.permute.xlu0 %337 }
 0x567   :  { %v340_v50 = vadd.f32 %v338_v49, %v330_v48 }
 0x569   :  { %791 = vtanh.f32 %v340_v50 }
 0x573   :  { %v792_v51 = vpop.eup %791 }
 0x574   :  { %343 = vrot.lane.b32.xlu1 %v792_v51, %s826_s8 }
 0x5e6   :  { %v344_v52 = vpop.permute.xlu1 %343 }
 0x5e7   :  { %v346_v53 = vmul.f32 %v790_v45, %v344_v52 }
 0x5e9   :  { %348 = vrot.lane.b32.xlu0 %v346_v53, %s828_s11 }
 0x65b   :  { %v349_v54 = vpop.permute.xlu0 %348 }
 0x65c   :  { %v351_v55 = vsel %vm158_vm2, %v349_v54, %v340_v50 }
 0x65d   :  { %353 = vrot.lane.b32.xlu1 %v351_v55, %s826_s8 }
 0x6cf   :  { %v354_v56 = vpop.permute.xlu1 %353 }
 0x6d0   :  { %v356_v57 = vsel %vm164_vm3, %v351_v55, %v354_v56 }
 0x6d1   :  { %v749_v58 = vpack.c.bf16 %v356_v57, %v165_v35 }
 0x6d3   :  { %750 = vmatpush3.bf16.msra.mxu1 %v749_v58 }
 0x6d4   :  { %757 = vmatprep.subr.bf16.mxu1 %v823_v2 }
 0x6d6   :  { %715 = vmatmul.mubr.msk.f32.vlgmr.msra.gmra.mrb[4].mxu1 %vm171_vm4, %v358_v59 }
 0x6d7   :  { %736 = vmatprep.mubr.msk.f32.mxu1 %vm824_vm0, %v825_v4  ;;  %v548_v4 = vld [vmem:[%s994_s5] sm:$0xff] }
 0x6d8   :  { %v758_v10 = vpack.c.bf16 %v549_v6, %v548_v4 }
 0x6da   :  { %759 = vmatpush3.bf16.msra.mxu1 %v758_v10 }
 0x6db   :  { %760 = vmatprep.subr.bf16.mxu1 %v823_v2 }
 0x6de   :  { %762 = vmatpush3.bf16.msra.mxu1 %v761_v12 }
 0x7a9   :  { %v431_v60 = vpop.f32.mrb[4].mxu1 }
 0x7aa   :  { %726 = vmatmul.mubr.msk.f32.vlgmr.msra.gmra.mrb[4].mxu0 %vm158_vm2, %v431_v60  ;;  %v716_v61 = vpop.f32.mrb[5].mxu1 }
 0x87d   :  { %v508_v63 = vpop.f32.mrb[4].mxu0 }
 0x87e   :  { %v512_v0 = vadd.f32 %v508_v63, %v129_v62  ;;  %v727_v1 = vpop.f32.mrb[5].mxu0 }
 0x880   :  { %793 = vtanh.f32 %v512_v0  ;;  %v654_v5 = vmul.f32 -1.442695, %v512_v0 }
 0x882   :  { %795 = vpow2.f32 %v654_v5 }
 0x88a   :  { %v794_v3 = vpop.eup %793 }
 0x88b   :  { %522 = vrot.lane.b32.xlu0 %v794_v3, %s826_s8  ;;  %s829_s8 = smov [#allocation3]  }
 0x88c   :  { %v796_v7 = vpop.eup %795  ;;  %s636_s9 = sshll.u32 %s829_s8, 4  ;;  %s637_s9 = int_to_ptr.vmem [resolvable:$true] %s636_s9 }
 0x88d   :  { %v516_v8 = vadd.f32 1.0, %v796_v7  ;;  %s799_s10 = scalar_lea.vmem %s637_s9, 16  ;;  %p804_p1 = scmp.lt.s32.totalorder %s637_s9, %s637_s9 }
 0x88e   :  { %p800_p0 = scmp.ne.s32.totalorder %s637_s9, %s799_s10 }
 0x88f   :  { %797 = vrcp.f32 %v516_v8 }
 0x899   :  { %v798_v13 = vpop.eup %797 }
 0x89a   :  { %v520_v16 = vmul.f32 %v798_v13, %v431_v60 }
 0x8fd   :  { %v523_v14 = vpop.permute.xlu0 %522 }
 0x8fe   :  { %v525_v15 = vmul.f32 %v798_v13, %v523_v14 }
 0x900   :  { %527 = vrot.lane.b32.xlu1 %v525_v15, %s828_s11  ;;  %s803_s11 = scalar_lea.vmem %s637_s9, 32 }
 0x901   :  { %p805_p2 = scmp.lt.s32.totalorder %s803_s11, %s799_s10 }
 0x903   :  { %p806_p3 = por %p805_p2, %p804_p1 }
 0x905   :  { %p807_p4 = pnand %p806_p3, %p800_p0 }
 0x972   :  { %v528_v17 = vpop.permute.xlu1 %527 }
 0x973   :  { %v530_v18 = vadd.f32 %v528_v17, %v520_v16 }
 0x975   :  { %554 = vrot.lane.b32.xlu0 %v530_v18, %s827_s3 }
 0x9e7   :  { %v555_v19 = vpop.permute.xlu0 %554 }
 0x9e8   :  { %737 = vmatmul.mubr.msk.f32.vlgmr.msra.gmra.mrb[6].mxu1 %vm158_vm2, %v555_v19 }
 0xabb   :  { %v624_v2 = vpop.f32.mrb[6].mxu1 }
 0xabc   :  { %v625_v21 = vadd.f32 %v624_v2, %v552_v20  ;;  %v738_v22 = vpop.f32.mrb[7].mxu1 }
 0xabe   :  { %629 = vst.msk [vmem:[#allocation3] sm:$0x1] %vm628_vm5, %v625_v21 }
 0xabf   :  { %810 = shalt.err (!%p807_p4)
}
 0xac0   :  { %s811_s6 = scalar_lea.hbm %s996_s7, 16 }
 0xac1   :  { %p812_p5 = scmp.ne.s32.totalorder %s996_s7, %s811_s6  ;;  %p815_p6 = scmp.lt.u32.totalorder %s811_s6, %s996_s7 }
 0xac3   :  { %p817_p7 = pnand %p815_p6, %p812_p5 }
 0xac5   :  { %820 = shalt.err (!%p817_p7)
}
 0xac6   :  { %639 = dma.vmem_to_hbm [thread:$0]  %s637_s9, 16, %s996_s7, [#allocation4]  }
 0xac7   :  { %821 = dma.done.wait [#allocation4], 16  }
 0xac8   :  { %822 = vsyncadd [#allocation4], 4294967280 }
 0xac9   :  { %643 = vsyncpa [#allocation4], 1 }

</bundles_post_ra>
